<compile_context>
chip_gen: v5e
topology: v5e:2x2
jax: 0.10.0
libtpu: 0.0.40
codegen_flags: <defaults>
</compile_context>

<pallas_src>
import functools

import jax
import jax.numpy as jnp
from jax.experimental import pallas as pl
from jax.experimental.pallas import tpu as pltpu


def _round_up(v, m):
    return ((v + m - 1) // m) * m


def _mlp_kernel(x_ref, w0_ref, b0_ref, w1_ref, b1_ref, o_ref, *, d_out):
    # One batch tile per grid step: matmuls on the MXU, ReLU on the VPU,
    # tanh on the EUP. Biases are (1, N) rows broadcast once per tile.
    x = x_ref[...]
    h = jnp.dot(x, w0_ref[...], preferred_element_type=jnp.float32) + b0_ref[...]
    h = jnp.maximum(h, 0.0)  # ReLU
    z = jnp.dot(h, w1_ref[...], preferred_element_type=jnp.float32) + b1_ref[...]
    # Slice off the lane padding BEFORE the store (lane-dense HBM writeback of
    # only the real D_out columns), then exact sigmoid via a single tanh.
    z = z[:, :d_out]
    o_ref[...] = (0.5 * (jnp.tanh(0.5 * z) + 1.0)).astype(o_ref.dtype)


def prepare_params(w0, b0, w1, b1):
    """Pad hidden/output dims to lane width (128) once, at parameter-prep time.

    Zero padding keeps the math exact: padded hidden lanes are relu(0) = 0 and
    padded w1 rows/columns contribute nothing; padded output lanes are sliced
    off inside the kernel before the store.
    """
    D_in, H = w0.shape
    D_out = w1.shape[1]
    H_pad = _round_up(max(H, 128), 128)
    O_pad = _round_up(max(D_out, 128), 128)
    w0p = jnp.pad(w0, ((0, 0), (0, H_pad - H)))
    b0p = jnp.pad(jnp.reshape(b0, (1, H)), ((0, 0), (0, H_pad - H)))
    w1p = jnp.pad(w1, ((0, H_pad - H), (0, O_pad - D_out)))
    b1p = jnp.pad(jnp.reshape(b1, (1, D_out)), ((0, 0), (0, O_pad - D_out)))
    return w0p, b0p, w1p, b1p, D_out


def _choose_tile_b(B, tile_b_cap):
    # Aim for >= 2 grid steps when there is enough work (second TC on v7x, and
    # lets x/out DMAs pipeline), cap the tile for per-step VMEM (safe on v5e's
    # 16 MiB scoped default), keep sublane (8) alignment.
    n_steps = max(2, pl.cdiv(B, tile_b_cap))
    return max(8, _round_up(pl.cdiv(B, n_steps), 8))


@functools.partial(jax.jit, static_argnames=("d_out", "tile_b_cap"))
def logistic_regression_forward(x, w0p, b0p, w1p, b1p, *, d_out, tile_b_cap=2048):
    """x: (B, D_in) f32; padded params from prepare_params."""
    B, D_in = x.shape
    H_pad = w0p.shape[1]
    O_pad = w1p.shape[1]

    TILE_B = _choose_tile_b(B, tile_b_cap)
    grid = (pl.cdiv(B, TILE_B),)  # ragged last block: rows independent, OOB writes dropped

    cost = pl.CostEstimate(
        flops=2 * B * D_in * H_pad + 2 * B * H_pad * O_pad,
        transcendentals=B * d_out,
        bytes_accessed=4 * (B * D_in + D_in * H_pad + H_pad
                            + H_pad * O_pad + O_pad + B * d_out),
    )

    out = pl.pallas_call(
        functools.partial(_mlp_kernel, d_out=d_out),
        out_shape=jax.ShapeDtypeStruct((B, d_out), jnp.float32),
        grid=grid,
        in_specs=[
            pl.BlockSpec((TILE_B, D_in), lambda i: (i, 0)),   # x tile: streamed
            pl.BlockSpec((D_in, H_pad), lambda i: (0, 0)),    # w0: VMEM-resident
            pl.BlockSpec((1, H_pad), lambda i: (0, 0)),       # b0: VMEM-resident
            pl.BlockSpec((H_pad, O_pad), lambda i: (0, 0)),   # w1: VMEM-resident
            pl.BlockSpec((1, O_pad), lambda i: (0, 0)),       # b1: VMEM-resident
        ],
        out_specs=pl.BlockSpec((TILE_B, d_out), lambda i: (i, 0)),  # unpadded writeback
        compiler_params=pltpu.CompilerParams(
            dimension_semantics=("parallel",),  # shard batch tiles across TCs (v7x)
        ),
        cost_estimate=cost,
    )(x, w0p, b0p, w1p, b1p)

    return out


if __name__ == "__main__":
    # Small, deterministic shapes consistent with the module's forward.
    B, D_in, H, D_out = 8, 32, 100, 4

    key = jax.random.PRNGKey(0)
    kx, kw0, kb0, kw1, kb1 = jax.random.split(key, 5)

    x = jax.random.normal(kx, (B, D_in), dtype=jnp.float32)

    # Deterministic parameter init (uniform, PyTorch-Linear-style bounds).
    bound0 = 1.0 / jnp.sqrt(D_in)
    w0 = jax.random.uniform(kw0, (D_in, H), minval=-bound0, maxval=bound0, dtype=jnp.float32)
    b0 = jax.random.uniform(kb0, (1, H), minval=-bound0, maxval=bound0, dtype=jnp.float32)
    bound1 = 1.0 / jnp.sqrt(H)
    w1 = jax.random.uniform(kw1, (H, D_out), minval=-bound1, maxval=bound1, dtype=jnp.float32)
    b1 = jax.random.uniform(kb1, (1, D_out), minval=-bound1, maxval=bound1, dtype=jnp.float32)

    # Pad weights/biases once (hoisted out of the per-call path).
    w0p, b0p, w1p, b1p, d_out = prepare_params(w0, b0, w1, b1)

    out = logistic_regression_forward(x, w0p, b0p, w1p, b1p, d_out=d_out)
    out = jax.block_until_ready(out)

    # Pure-JAX reference check of the same math.
    ref = jax.nn.sigmoid(jnp.maximum(x @ w0 + b0, 0.0) @ w1 + b1)
    assert out.shape == (B, D_out)
    assert jnp.allclose(out, ref, atol=1e-5, rtol=1e-5)

    print("KERNEL_OK")
</pallas_src>

<mosaic_0001>
module attributes {stable_mosaic.version = 11 : i64} {
  func.func @_mlp_kernel(%arg0: i32, %arg1: memref<8x32xf32, #tpu.memory_space<vmem>>, %arg2: memref<32x128xf32, #tpu.memory_space<vmem>>, %arg3: memref<1x128xf32, #tpu.memory_space<vmem>>, %arg4: memref<128x128xf32, #tpu.memory_space<vmem>>, %arg5: memref<1x128xf32, #tpu.memory_space<vmem>>, %arg6: memref<8x4xf32, #tpu.memory_space<vmem>>) attributes {dimension_semantics = [#tpu.dimension_semantics<parallel>], iteration_bounds = array<i64: 1>, scalar_prefetch = 0 : i64, scratch_operands = 0 : i64, tpu.core_type = #tpu.core_type<tc>, window_params = [{transform_indices = @transform_0, window_bounds = array<i64: 8, 32>}, {pipeline_mode = #tpu.pipeline_mode<synchronous>, transform_indices = @transform_1, window_bounds = array<i64: 32, 128>}, {pipeline_mode = #tpu.pipeline_mode<synchronous>, transform_indices = @transform_2, window_bounds = array<i64: 1, 128>}, {pipeline_mode = #tpu.pipeline_mode<synchronous>, transform_indices = @transform_3, window_bounds = array<i64: 128, 128>}, {pipeline_mode = #tpu.pipeline_mode<synchronous>, transform_indices = @transform_4, window_bounds = array<i64: 1, 128>}, {transform_indices = @transform_5, window_bounds = array<i64: 8, 4>}]} {
    %c0 = arith.constant 0 : index
    %c0_0 = arith.constant 0 : index
    %0 = vector.load %arg1[%c0, %c0_0] : memref<8x32xf32, #tpu.memory_space<vmem>>, vector<8x32xf32>
    %c0_1 = arith.constant 0 : index
    %c0_2 = arith.constant 0 : index
    %1 = vector.load %arg2[%c0_1, %c0_2] : memref<32x128xf32, #tpu.memory_space<vmem>>, vector<32x128xf32>
    %cst = arith.constant dense<0.000000e+00> : vector<8x128xf32>
    %2 = tpu.matmul %0, %1, %cst {dimension_numbers = #tpu.dot_dimension_numbers<[1], [0], [0], [1], [0, 0, 1, 1], [], []>} : vector<8x32xf32>, vector<32x128xf32>, vector<8x128xf32> -> vector<8x128xf32>
    %c0_3 = arith.constant 0 : index
    %c0_4 = arith.constant 0 : index
    %3 = vector.load %arg3[%c0_3, %c0_4] : memref<1x128xf32, #tpu.memory_space<vmem>>, vector<1x128xf32>
    %4 = vector.broadcast %3 : vector<1x128xf32> to vector<8x128xf32>
    %5 = arith.addf %2, %4 : vector<8x128xf32>
    %cst_5 = arith.constant 0.000000e+00 : f32
    %6 = vector.broadcast %cst_5 : f32 to vector<8x128xf32>
    %7 = arith.maximumf %5, %6 : vector<8x128xf32>
    %c0_6 = arith.constant 0 : index
    %c0_7 = arith.constant 0 : index
    %8 = vector.load %arg4[%c0_6, %c0_7] : memref<128x128xf32, #tpu.memory_space<vmem>>, vector<128x128xf32>
    %cst_8 = arith.constant dense<0.000000e+00> : vector<8x128xf32>
    %9 = tpu.matmul %7, %8, %cst_8 {dimension_numbers = #tpu.dot_dimension_numbers<[1], [0], [0], [1], [0, 0, 1, 1], [], []>} : vector<8x128xf32>, vector<128x128xf32>, vector<8x128xf32> -> vector<8x128xf32>
    %c0_9 = arith.constant 0 : index
    %c0_10 = arith.constant 0 : index
    %10 = vector.load %arg5[%c0_9, %c0_10] : memref<1x128xf32, #tpu.memory_space<vmem>>, vector<1x128xf32>
    %11 = vector.broadcast %10 : vector<1x128xf32> to vector<8x128xf32>
    %12 = arith.addf %9, %11 : vector<8x128xf32>
    %13 = vector.extract_strided_slice %12 {offsets = [0, 0], sizes = [8, 4], strides = [1, 1]} : vector<8x128xf32> to vector<8x4xf32>
    %cst_11 = arith.constant 5.000000e-01 : f32
    %14 = vector.broadcast %cst_11 : f32 to vector<8x4xf32>
    %15 = arith.mulf %14, %13 : vector<8x4xf32>
    %16 = math.tanh %15 : vector<8x4xf32>
    %cst_12 = arith.constant 1.000000e+00 : f32
    %17 = vector.broadcast %cst_12 : f32 to vector<8x4xf32>
    %18 = arith.addf %16, %17 : vector<8x4xf32>
    %cst_13 = arith.constant 5.000000e-01 : f32
    %19 = vector.broadcast %cst_13 : f32 to vector<8x4xf32>
    %20 = arith.mulf %19, %18 : vector<8x4xf32>
    %c0_14 = arith.constant 0 : index
    %c0_15 = arith.constant 0 : index
    %21 = vector.load %arg6[%c0_14, %c0_15] : memref<8x4xf32, #tpu.memory_space<vmem>>, vector<8x4xf32>
    tpu.vector_store %arg6[%c0_14, %c0_15], %20 {strides = array<i32>} : memref<8x4xf32, #tpu.memory_space<vmem>>, vector<8x4xf32>,
    return
  }
  func.func @transform_0(%arg0: i32) -> (i32, i32) {
    %c0_i32 = arith.constant 0 : i32
    %c0_i32_0 = arith.constant 0 : i32
    return %arg0, %c0_i32 : i32, i32
  }
  func.func @transform_1(%arg0: i32) -> (i32, i32) {
    %c0_i32 = arith.constant 0 : i32
    %c0_i32_0 = arith.constant 0 : i32
    %c0_i32_1 = arith.constant 0 : i32
    return %c0_i32, %c0_i32_0 : i32, i32
  }
  func.func @transform_2(%arg0: i32) -> (i32, i32) {
    %c0_i32 = arith.constant 0 : i32
    %c0_i32_0 = arith.constant 0 : i32
    %c0_i32_1 = arith.constant 0 : i32
    return %c0_i32, %c0_i32_0 : i32, i32
  }
  func.func @transform_3(%arg0: i32) -> (i32, i32) {
    %c0_i32 = arith.constant 0 : i32
    %c0_i32_0 = arith.constant 0 : i32
    %c0_i32_1 = arith.constant 0 : i32
    return %c0_i32, %c0_i32_0 : i32, i32
  }
  func.func @transform_4(%arg0: i32) -> (i32, i32) {
    %c0_i32 = arith.constant 0 : i32
    %c0_i32_0 = arith.constant 0 : i32
    %c0_i32_1 = arith.constant 0 : i32
    return %c0_i32, %c0_i32_0 : i32, i32
  }
  func.func @transform_5(%arg0: i32) -> (i32, i32) {
    %c0_i32 = arith.constant 0 : i32
    %c0_i32_0 = arith.constant 0 : i32
    return %arg0, %c0_i32 : i32, i32
  }
}

</mosaic_0001>

<bundles_post_ra>
// kernel: logistic_regression_forward.1
= control target key start
LH: loop header
LB: loop body
LE: loop exit
PB: predicated region body
PF: predicated region fallthrough
CT: control target
= control target key end

     0   :  { %10 = vsyncpa [#allocation3], 0  ;;  %s290_s0 = inlined_call_operand.hbm [shape: f32[8,32], index: 0, kind: input, shape index: {}]   ;;  %s291_s1 = inlined_call_operand.hbm [shape: f32[32,128], index: 1, kind: input, shape index: {}]   ;;  %s292_s2 = inlined_call_operand.vmem [shape: f32[1,128], index: 2, kind: input, shape index: {}]   ;;  %s293_s3 = inlined_call_operand.hbm [shape: f32[128,128], index: 3, kind: input, shape index: {}]   ;;  %s294_s4 = inlined_call_operand.vmem [shape: f32[1,128], index: 4, kind: input, shape index: {}]   ;;  %s295_s5 = inlined_call_operand.vmem [shape: f32[8,4], index: 5, kind: output, shape index: {}]  }
   0x1   :  { %11 = vsyncpa [#allocation5], 0  ;;  %s27_s20 = sshll.u32 %s291_s1, 4  ;;  %s237_s21 = smov [#allocation4]   ;;  %s28_s20 = int_to_ptr.hbm [resolvable:$true] %s27_s20 }
   0x2   :  { %s29_s22 = sshll.u32 %s237_s21, 4  ;;  %s17_s25 = sshll.u32 %s290_s0, 4  ;;  %s30_s22 = int_to_ptr.vmem [resolvable:$true] %s29_s22  ;;  %s18_s25 = int_to_ptr.hbm [resolvable:$true] %s17_s25 }
   0x3   :  { %s238_s26 = smov 128   ;;  %s239_s27 = smov 8  }
   0x4   :  { %35 = dma.hbm_to_vmem [thread:$0]  %s28_s20, 512, %s30_s22, [#allocation5], %s238_s26, %s238_s26, %s239_s27  }
   0x5   :  { %s240_s28 = smov [#allocation2]   ;;  %s42_s7 = sshll.u32 %s293_s3, 4  ;;  %s43_s7 = int_to_ptr.hbm [resolvable:$true] %s42_s7 }
   0x6   :  { %s19_s29 = sshll.u32 %s240_s28, 4  ;;  %s241_s1 = smov [#allocation6]   ;;  %s20_s29 = int_to_ptr.vmem [resolvable:$true] %s19_s29 }
   0x7   :  { %22 = dma.hbm_to_vmem [thread:$0]  %s18_s25, 128, %s20_s29, [#allocation3]  }
   0x8   :  { %s44_s8 = sshll.u32 %s241_s1, 4  ;;  %s45_s8 = int_to_ptr.vmem [resolvable:$true] %s44_s8 }
   0x9   :  { %50 = dma.hbm_to_vmem [thread:$0]  %s43_s7, 2048, %s45_s8, [#allocation5], %s238_s26, %s238_s26, %s239_s27  }
   0xa   :  { %233 = dma.done.wait [#allocation3], 128  }
   0xb   :  { %234 = vsyncadd [#allocation3], 4294967168 }
   0xc   :  { %235 = dma.done.wait [#allocation5], 2560  }
   0xd   :  { %236 = vsyncadd [#allocation5], 4294964736  ;;  %v69_v0 = vld [vmem:[#allocation4 + $0x18] sm:$0xff]  ;;  %v68_v1 = vld [vmem:[#allocation4 + $0x10] sm:$0xff]  ;;  %vm74_vm0 = vcmask 261120   ;;  %vm143_vm1 = vcmask 31744  }
   0xe   :  { %90 = vmatpush.msra.mxu0 %v69_v0  ;;  %v114_v2 = vld [vmem:[#allocation6 + $0x78] sm:$0xff]  ;;  %v67_v3 = vld [vmem:[#allocation4 + $0x8] sm:$0xff]  ;;  %v113_v4 = vld [vmem:[#allocation6 + $0x70] sm:$0xff] }
   0xf   :  { %119 = vmatpush.msra.mxu1 %v114_v2  ;;  %v112_v5 = vld [vmem:[#allocation6 + $0x68] sm:$0xff]  ;;  %v66_v6 = vld [vmem:[#allocation4] sm:$0xff]  ;;  %v65_v7 = vld [vmem:[#allocation2] sm:$0xff] }
  0x10   :  { %91 = vmatpush.msra.mxu0 %v68_v1  ;;  %v111_v8 = vld [vmem:[#allocation6 + $0x60] sm:$0xff]  ;;  %v110_v9 = vld [vmem:[#allocation6 + $0x58] sm:$0xff]  ;;  %v109_v10 = vld [vmem:[#allocation6 + $0x50] sm:$0xff] }
  0x11   :  { %120 = vmatpush.msra.mxu1 %v113_v4  ;;  %v108_v11 = vld [vmem:[#allocation6 + $0x48] sm:$0xff]  ;;  %v107_v12 = vld [vmem:[#allocation6 + $0x40] sm:$0xff]  ;;  %v106_v13 = vld [vmem:[#allocation6 + $0x38] sm:$0xff] }
  0x12   :  { %92 = vmatpush.msra.mxu0 %v67_v3  ;;  %v105_v14 = vld [vmem:[#allocation6 + $0x30] sm:$0xff]  ;;  %v104_v15 = vld [vmem:[#allocation6 + $0x28] sm:$0xff]  ;;  %v103_v16 = vld [vmem:[#allocation6 + $0x20] sm:$0xff] }
  0x13   :  { %121 = vmatpush.msra.mxu1 %v112_v5  ;;  %v102_v17 = vld [vmem:[#allocation6 + $0x18] sm:$0xff]  ;;  %v101_v18 = vld [vmem:[#allocation6 + $0x10] sm:$0xff]  ;;  %v100_v19 = vld [vmem:[#allocation6 + $0x8] sm:$0xff] }
  0x14   :  { %93 = vmatpush.msra.mxu0 %v66_v6  ;;  %v99_v20 = vld [vmem:[#allocation6] sm:$0xff]  ;;  %v157_v21 = vld [vmem:[%s292_s2] ss:$0 sm:$0xff] }
  0x15   :  { %151 = vmatmul.msk.f32.vlgmr.msra.gmra.mxu0 %vm74_vm0, %v65_v7  ;;  %122 = vmatpush.msra.mxu1 %v111_v8  ;;  %v158_v25 = vld [vmem:[%s294_s4] ss:$0 sm:$0xff] }
  0x17   :  { %123 = vmatpush.msra.mxu1 %v110_v9 }
  0x19   :  { %124 = vmatpush.msra.mxu1 %v109_v10 }
  0x1b   :  { %125 = vmatpush.msra.mxu1 %v108_v11 }
  0x1d   :  { %126 = vmatpush.msra.mxu1 %v107_v12 }
  0x1f   :  { %127 = vmatpush.msra.mxu1 %v106_v13 }
  0x21   :  { %128 = vmatpush.msra.mxu1 %v105_v14 }
  0x23   :  { %129 = vmatpush.msra.mxu1 %v104_v15 }
  0x25   :  { %130 = vmatpush.msra.mxu1 %v103_v16 }
  0x27   :  { %131 = vmatpush.msra.mxu1 %v102_v17 }
  0x29   :  { %132 = vmatpush.msra.mxu1 %v101_v18 }
  0x2b   :  { %133 = vmatpush.msra.mxu1 %v100_v19 }
  0x2d   :  { %134 = vmatpush.msra.mxu1 %v99_v20 }
  0x92   :  { %v95_v22 = vpop.f32.mrf.mxu0 }
  0x93   :  { %v96_v23 = vadd.f32 %v157_v21, %v95_v22 }
  0x95   :  { %v98_v24 = vmax.f32 %v96_v23, 0.0 }
  0x97   :  { %135 = vmatmul.f32.vlgmr.msra.gmra.mxu1 %v98_v24 }
 0x114   :  { %v136_v26 = vpop.f32.mrf.mxu1 }
 0x115   :  { %v137_v27 = vadd.f32 %v158_v25, %v136_v26 }
 0x117   :  { %v139_v28 = vmul.f32 0.5, %v137_v27 }
 0x119   :  { %159 = vtanh.f32 %v139_v28 }
 0x11f   :  { %v160_v29 = vpop.eup %159 }
 0x120   :  { %v141_v30 = vadd.f32 1.0, %v160_v29 }
 0x122   :  { %v142_v31 = vmul.f32 0.5, %v141_v30 }
 0x124   :  { %144 = vst.msk [vmem:[%s295_s5] sm:$0xff] %vm143_vm1, %v142_v31 }
 0x125   :  { %149 = vsyncpa [#allocation3], 1 }
 0x126   :  { %150 = vsyncpa [#allocation5], 1 }

</bundles_post_ra>
